<compile_context>
chip_gen: v7x
topology: tpu7x:2x2x1
jax: 0.10.0
libtpu: 0.0.40
codegen_flags: <defaults>
</compile_context>

<pallas_src>
import functools

import jax
import jax.numpy as jnp
from jax import lax
from jax.experimental import pallas as pl
from jax.experimental.pallas import tpu as pltpu

_LANES = 128


def _is_integer_exponent(exponent):
    if isinstance(exponent, bool):
        return False
    if isinstance(exponent, int):
        return True
    if isinstance(exponent, float):
        return float(exponent).is_integer()
    return False


def _pow_kernel(x_ref, o_ref, *, exponent):
    x = x_ref[...]
    if exponent == 2:
        # FloatFunctional.mul(input, input) path: single VALU multiply.
        out = x * x
    elif _is_integer_exponent(exponent):
        e = int(exponent)
        if e == 0:
            out = jnp.ones_like(x)
        elif e == 1:
            out = x
        else:
            # Integer pow via exponentiation-by-squaring (VALU, not EUP).
            # Compute in f32 for accuracy (v5e VPU has no native bf16 anyway).
            out = lax.integer_pow(x.astype(jnp.float32), e)
    else:
        # SegmentLUT(lambda x: pow(x, exponent)) path with a non-integer
        # exponent: exp(e*log(x)) on the EUP, computed in f32.
        out = jnp.power(x.astype(jnp.float32), jnp.float32(exponent))
    o_ref[...] = out.astype(o_ref.dtype)


def pallas_pow(x, exponent=2, tile_bytes=2 * 1024 * 1024):
    """Elementwise x ** exponent via a Pallas TPU kernel.

    x: any-shaped float array (NCHW expected from the PyTorch module).
    exponent: python int/float scalar (static).
    tile_bytes: target per-grid-step tile size (double-buffered in+out stays
        within the v5e 16 MiB scoped-VMEM default at the 2 MiB default).
    """
    orig_shape = x.shape
    orig_dtype = x.dtype
    total = x.size
    itemsize = jnp.dtype(orig_dtype).itemsize

    # Native sublane tiling per dtype: 8 for 4-byte, 16 for bf16, 32 for int8.
    sublanes = max(8, 32 // itemsize)

    # Rows of 128-lane vectors needed for the whole tensor.
    rows_needed = pl.cdiv(total, _LANES)
    rows_aligned = pl.cdiv(rows_needed, sublanes) * sublanes

    # Large tiles (~tile_bytes), aligned to the dtype's native sublane tiling,
    # capped at the (aligned) number of rows actually present.
    block_rows = max(
        sublanes, (tile_bytes // (_LANES * itemsize)) // sublanes * sublanes
    )
    block_rows = min(block_rows, rows_aligned)

    # Pad the row count UP to a multiple of block_rows (single pad, done once
    # on the flat vector) so every grid step is a full, unmasked tile.
    num_blocks = pl.cdiv(rows_needed, block_rows)
    padded_rows = num_blocks * block_rows
    padded_total = padded_rows * _LANES

    flat = jnp.reshape(x, (-1,))
    if padded_total != total:
        # Pad with ones so exponent <= 0 stays finite in the (discarded) tail.
        flat = jnp.pad(flat, (0, padded_total - total), constant_values=1)
    slab = jnp.reshape(flat, (padded_rows, _LANES))

    kernel = functools.partial(_pow_kernel, exponent=exponent)

    out_slab = pl.pallas_call(
        kernel,
        out_shape=jax.ShapeDtypeStruct((padded_rows, _LANES), orig_dtype),
        grid=(num_blocks,),
        in_specs=[pl.BlockSpec((block_rows, _LANES), lambda i: (i, 0))],
        out_specs=pl.BlockSpec((block_rows, _LANES), lambda i: (i, 0)),
        compiler_params=pltpu.CompilerParams(
            dimension_semantics=("parallel",)
        ),
    )(slab)

    out_flat = jnp.reshape(out_slab, (-1,))
    if padded_total != total:
        out_flat = out_flat[:total]
    return jnp.reshape(out_flat, orig_shape)


if __name__ == "__main__":
    key = jax.random.PRNGKey(0)
    # NCHW, small shapes consistent with a conv-style activation tensor.
    x = jax.random.normal(key, (2, 4, 16, 16), dtype=jnp.float32)

    # exponent = 2 path (FloatFunctional.mul(x, x))
    out2 = jax.block_until_ready(pallas_pow(x, exponent=2))
    ref2 = x * x
    assert out2.shape == x.shape and out2.dtype == x.dtype
    assert jnp.max(jnp.abs(out2 - ref2)) < 1e-6

    # integer exponent != 2 path (SegmentLUT pow, handled via integer_pow)
    out3 = jax.block_until_ready(pallas_pow(x, exponent=3))
    ref3 = x * x * x
    assert jnp.max(jnp.abs(out3 - ref3)) < 1e-5

    # non-integer exponent path (float pow on positive inputs)
    xp = jnp.abs(x) + 0.1
    outh = jax.block_until_ready(pallas_pow(xp, exponent=0.5))
    refh = jnp.sqrt(xp)
    assert jnp.max(jnp.abs(outh - refh)) < 1e-4

    print("KERNEL_OK")
</pallas_src>

<mosaic_0001>
module attributes {stable_mosaic.version = 11 : i64} {
  func.func @_pow_kernel(%arg0: i32, %arg1: memref<16x128xf32, #tpu.memory_space<vmem>>, %arg2: memref<16x128xf32, #tpu.memory_space<vmem>>) attributes {dimension_semantics = [#tpu.dimension_semantics<parallel>], iteration_bounds = array<i64: 1>, scalar_prefetch = 0 : i64, scratch_operands = 0 : i64, tpu.core_type = #tpu.core_type<tc>, window_params = [{transform_indices = @transform_0, window_bounds = array<i64: 16, 128>}, {transform_indices = @transform_1, window_bounds = array<i64: 16, 128>}]} {
    %c0 = arith.constant 0 : index
    %c0_0 = arith.constant 0 : index
    %0 = vector.load %arg1[%c0, %c0_0] : memref<16x128xf32, #tpu.memory_space<vmem>>, vector<16x128xf32>
    %1 = arith.mulf %0, %0 : vector<16x128xf32>
    %c0_1 = arith.constant 0 : index
    %c0_2 = arith.constant 0 : index
    %2 = vector.load %arg2[%c0_1, %c0_2] : memref<16x128xf32, #tpu.memory_space<vmem>>, vector<16x128xf32>
    tpu.vector_store %arg2[%c0_1, %c0_2], %1 {strides = array<i32>} : memref<16x128xf32, #tpu.memory_space<vmem>>, vector<16x128xf32>,
    return
  }
  func.func @transform_0(%arg0: i32) -> (i32, i32) {
    %c0_i32 = arith.constant 0 : i32
    %c0_i32_0 = arith.constant 0 : i32
    return %arg0, %c0_i32 : i32, i32
  }
  func.func @transform_1(%arg0: i32) -> (i32, i32) {
    %c0_i32 = arith.constant 0 : i32
    %c0_i32_0 = arith.constant 0 : i32
    return %arg0, %c0_i32 : i32, i32
  }
}

</mosaic_0001>

<bundles_post_ra>
// kernel: tpu_custom_call.1
= control target key start
LH: loop header
LB: loop body
LE: loop exit
PB: predicated region body
PF: predicated region fallthrough
CT: control target
= control target key end

     0   :  { %6 = vsyncpa [#allocation3], 0  ;;  %s136_s0 = inlined_call_operand.hbm [shape: f32[16,128], index: 0, kind: input, shape index: {}]   ;;  %s137_s1 = inlined_call_operand.hbm [shape: f32[16,128], index: 1, kind: output, shape index: {}]  }
   0x1   :  { %7 = vsyncpa [#allocation4], 0  ;;  %s98_s6 = smov [#allocation2]   ;;  %s50_s10 = scalar_lea.hbm %s136_s0, 256 }
   0x2   :  { %s13_s7 = sshll.u32 %s98_s6, 4  ;;  %p51_p0 = scmp.ne.s32.totalorder %s136_s0, %s50_s10  ;;  %s14_s7 = int_to_ptr.vmem [resolvable:$true] %s13_s7 }
   0x3   :  { %p54_p1 = scmp.lt.u32.totalorder %s50_s10, %s136_s0 }
   0x5   :  { %p56_p2 = pnand %p54_p1, %p51_p0 }
   0x7   :  { %59 = shalt.err (!%p56_p2)
}
   0x8   :  { %s60_s15 = scalar_lea.vmem %s14_s7, 256  ;;  %p65_p4 = scmp.lt.s32.totalorder %s14_s7, %s14_s7 }
   0x9   :  { %p61_p3 = scmp.ne.s32.totalorder %s14_s7, %s60_s15  ;;  %p66_p5 = scmp.lt.s32.totalorder %s60_s15, %s60_s15 }
   0xb   :  { %p67_p6 = por %p66_p5, %p65_p4 }
   0xd   :  { %p68_p7 = pnand %p67_p6, %p61_p3 }
   0xf   :  { %71 = shalt.err (!%p68_p7)
}
  0x10   :  { %s99_s16 = smov 128   ;;  %s100_s17 = smov 8  }
  0x11   :  { %19 = dma.hbm_to_vmem [thread:$0]  %s136_s0, 256, %s14_s7, [#allocation3], %s99_s16, %s99_s16, %s100_s17  }
  0x12   :  { %94 = dma.done.wait [#allocation3], 256  }
  0x13   :  { %95 = vsyncadd [#allocation3], 4294967040  ;;  %s101_s20 = smov [#allocation5]   ;;  %v23_v0 = vld [vmem:[#allocation2] sm:$0xff]  ;;  %v24_v1 = vld [vmem:[#allocation2 + $0x8] sm:$0xff] }
  0x14   :  { %s34_s21 = sshll.u32 %s101_s20, 4  ;;  %v25_v2 = vmul.f32 %v23_v0, %v23_v0  ;;  %v26_v3 = vmul.f32 %v24_v1, %v24_v1  ;;  %s35_s21 = int_to_ptr.vmem [resolvable:$true] %s34_s21 }
  0x15   :  { %s72_s22 = scalar_lea.vmem %s35_s21, 256  ;;  %p77_p9 = scmp.lt.s32.totalorder %s35_s21, %s35_s21 }
  0x16   :  { %27 = vst [vmem:[#allocation5] sm:$0xff] %v25_v2  ;;  %28 = vst [vmem:[#allocation5 + $0x8] sm:$0xff] %v26_v3  ;;  %p73_p8 = scmp.ne.s32.totalorder %s35_s21, %s72_s22  ;;  %p78_p10 = scmp.lt.s32.totalorder %s72_s22, %s72_s22 }
  0x18   :  { %p79_p11 = por %p78_p10, %p77_p9 }
  0x1a   :  { %p80_p12 = pnand %p79_p11, %p73_p8 }
  0x1c   :  { %83 = shalt.err (!%p80_p12)
}
  0x1d   :  { %s84_s24 = scalar_lea.hbm %s137_s1, 256 }
  0x1e   :  { %p85_p13 = scmp.ne.s32.totalorder %s137_s1, %s84_s24  ;;  %p88_p0 = scmp.lt.u32.totalorder %s84_s24, %s137_s1 }
  0x20   :  { %p90_p1 = pnand %p88_p0, %p85_p13 }
  0x22   :  { %93 = shalt.err (!%p90_p1)
}
  0x23   :  { %40 = dma.vmem_to_hbm [thread:$0]  %s35_s21, 256, %s137_s1, [#allocation4], %s99_s16, %s99_s16, %s100_s17  }
  0x24   :  { %96 = dma.done.wait [#allocation4], 256  }
  0x25   :  { %97 = vsyncadd [#allocation4], 4294967040 }
  0x26   :  { %44 = vsyncpa [#allocation3], 1 }
  0x27   :  { %45 = vsyncpa [#allocation4], 1 }

</bundles_post_ra>
